<compile_context>
chip_gen: v7x
topology: tpu7x:2x2x1
jax: 0.10.0
libtpu: 0.0.40
codegen_flags: <defaults>
</compile_context>

<pallas_src>
import jax
import jax.numpy as jnp
from jax.experimental import pallas as pl
from jax.experimental.pallas import tpu as pltpu


def _round_up(x, m):
    return ((x + m - 1) // m) * m


def _matmul_bias_kernel(x_ref, w_ref, b_ref, o_ref, acc_ref):
    """One (TM, TN) output tile; grid axis 2 is the K reduction.

    x_ref:   (TM, TK)  im2col activation tile
    w_ref:   (TK, TN)  folded (KH*KW*Cin, Cout) weight tile
    b_ref:   (1,  TN)  bias tile
    o_ref:   (TM, TN)  lane-dense output tile (TN multiple of 128)
    acc_ref: (TM, TN)  fp32 VMEM accumulator scratch
    """
    k = pl.program_id(2)

    @pl.when(k == 0)
    def _():
        acc_ref[...] = jnp.zeros_like(acc_ref)

    acc_ref[...] += jnp.dot(x_ref[...], w_ref[...],
                            preferred_element_type=jnp.float32)

    @pl.when(k == pl.num_programs(2) - 1)
    def _():
        # bias broadcast + dtype cast only in the finalize step
        o_ref[...] = (acc_ref[...] + b_ref[...]).astype(o_ref.dtype)


def meta_conv2d_forward(x_nchw, weight_oihw, bias,
                        stride=(1, 1), padding=(1, 1), dilation=(1, 1),
                        groups=1, *, tm=256, tn=128):
    """Equivalent of F.conv2d(x, weight, bias, stride, padding, dilation, groups)."""
    # TODO(synk): grouped / depthwise conv (groups > 1) not implemented.
    assert groups == 1, "only groups=1 supported"

    N, Cin, H, W = x_nchw.shape
    Cout, Cin_w, KH, KW = weight_oihw.shape
    assert Cin_w == Cin
    sh, sw = stride
    ph, pw = padding
    dh, dw = dilation
    Ho = (H + 2 * ph - dh * (KH - 1) - 1) // sh + 1
    Wo = (W + 2 * pw - dw * (KW - 1) - 1) // sw + 1
    dtype = x_nchw.dtype

    # ---- host-side glue: layout + im2col (fold KH*KW*Cin into K) ----
    # TODO(synk): for large Cin, DMA-driven per-tap shifting (tap grid axis with
    # shifted-window index_map) avoids the KH*KW-fold HBM expansion of im2col.
    x_nhwc = jnp.transpose(x_nchw, (0, 2, 3, 1))
    x_pad = jnp.pad(x_nhwc, ((0, 0), (ph, ph), (pw, pw), (0, 0)))

    patches = []
    for kh in range(KH):
        for kw in range(KW):
            h0 = kh * dh
            w0 = kw * dw
            patches.append(
                x_pad[:, h0:h0 + (Ho - 1) * sh + 1:sh,
                         w0:w0 + (Wo - 1) * sw + 1:sw, :])  # (N, Ho, Wo, Cin)
    # (N, Ho, Wo, KH*KW, Cin) -> (M, K); K ordered (kh, kw, cin) to match HWIO.
    x2d = jnp.stack(patches, axis=3).reshape(N * Ho * Wo, KH * KW * Cin)

    w2d = jnp.transpose(weight_oihw, (2, 3, 1, 0)).reshape(KH * KW * Cin, Cout)
    if bias is None:
        b1 = jnp.zeros((Cout,), dtype=dtype)
    else:
        b1 = bias.astype(dtype)

    M, K = x2d.shape

    # ---- tiling / padding for lane-dense, (8,128)-aligned blocks ----
    cout_p = _round_up(Cout, tn)          # lane-dense output (Cout -> mult of 128)
    m_p = _round_up(M, tm)
    if K <= 512:
        tk = K                            # full-K block (== full array dim: allowed)
        k_p = K
    else:
        tk = 256
        k_p = _round_up(K, tk)

    x2d_p = jnp.pad(x2d, ((0, m_p - M), (0, k_p - K)))
    w2d_p = jnp.pad(w2d, ((0, k_p - K), (0, cout_p - Cout)))
    b2d_p = jnp.pad(b1.reshape(1, Cout), ((0, 0), (0, cout_p - Cout)))

    grid = (m_p // tm, cout_p // tn, k_p // tk)

    out2d = pl.pallas_call(
        _matmul_bias_kernel,
        out_shape=jax.ShapeDtypeStruct((m_p, cout_p), dtype),
        grid_spec=pltpu.PrefetchScalarGridSpec(
            num_scalar_prefetch=0,
            grid=grid,
            in_specs=[
                pl.BlockSpec((tm, tk), lambda i, j, k: (i, k)),
                pl.BlockSpec((tk, tn), lambda i, j, k: (k, j)),
                pl.BlockSpec((1, tn), lambda i, j, k: (0, j)),
            ],
            out_specs=pl.BlockSpec((tm, tn), lambda i, j, k: (i, j)),
            scratch_shapes=[pltpu.VMEM((tm, tn), jnp.float32)],
        ),
        compiler_params=pltpu.CompilerParams(
            dimension_semantics=("parallel", "parallel", "arbitrary")),
    )(x2d_p, w2d_p, b2d_p)

    # un-pad + back to NCHW (free layout plumbing outside the kernel)
    out_nhwc = out2d[:M, :Cout].reshape(N, Ho, Wo, Cout)
    return jnp.transpose(out_nhwc, (0, 3, 1, 2))


if __name__ == "__main__":
    # MetaConv2d(in_channels=4, out_channels=8, kernel_size=3, padding=1)
    N, Cin, H, W = 2, 4, 16, 16
    Cout, KH, KW = 8, 3, 3
    stride, padding, dilation, groups = (1, 1), (1, 1), (1, 1), 1

    key = jax.random.PRNGKey(0)
    kx, kw_, kb = jax.random.split(key, 3)

    x = jax.random.normal(kx, (N, Cin, H, W), dtype=jnp.float32)

    # Deterministic PyTorch-style Conv2d init: U(-1/sqrt(fan_in), 1/sqrt(fan_in))
    fan_in = Cin * KH * KW
    bound = 1.0 / (fan_in ** 0.5)
    weight = jax.random.uniform(kw_, (Cout, Cin, KH, KW),
                                minval=-bound, maxval=bound, dtype=jnp.float32)
    bias = jax.random.uniform(kb, (Cout,), minval=-bound, maxval=bound,
                              dtype=jnp.float32)

    out = meta_conv2d_forward(x, weight, bias, stride, padding, dilation, groups)
    out = jax.block_until_ready(out)

    # Reference check against XLA's conv (same semantics as F.conv2d).
    ref = jax.lax.conv_general_dilated(
        x, weight, window_strides=stride, padding=[(1, 1), (1, 1)],
        rhs_dilation=dilation,
        dimension_numbers=("NCHW", "OIHW", "NCHW"),
    ) + bias.reshape(1, Cout, 1, 1)
    ref = jax.block_until_ready(ref)

    assert out.shape == (N, Cout, H, W)
    assert jnp.allclose(out, ref, atol=1e-5, rtol=1e-5)
    print("KERNEL_OK")
</pallas_src>

<mosaic_0001>
module attributes {stable_mosaic.version = 11 : i64} {
  func.func @_matmul_bias_kernel(%arg0: i32, %arg1: i32, %arg2: i32, %arg3: memref<256x36xf32, #tpu.memory_space<vmem>>, %arg4: memref<36x128xf32, #tpu.memory_space<vmem>>, %arg5: memref<1x128xf32, #tpu.memory_space<vmem>>, %arg6: memref<256x128xf32, #tpu.memory_space<vmem>>, %arg7: memref<256x128xf32, #tpu.memory_space<vmem>>) attributes {dimension_semantics = [#tpu.dimension_semantics<parallel>, #tpu.dimension_semantics<parallel>, #tpu.dimension_semantics<arbitrary>], iteration_bounds = array<i64: 2, 1, 1>, scalar_prefetch = 0 : i64, scratch_operands = 1 : i64, tpu.core_type = #tpu.core_type<tc>, window_params = [{transform_indices = @transform_0, window_bounds = array<i64: 256, 36>}, {transform_indices = @transform_1, window_bounds = array<i64: 36, 128>}, {transform_indices = @transform_2, window_bounds = array<i64: 1, 128>}, {transform_indices = @transform_3, window_bounds = array<i64: 256, 128>}]} {
    %c0_i32 = arith.constant 0 : i32
    %0 = arith.cmpi eq, %arg2, %c0_i32 : i32
    %1 = arith.extui %0 : i1 to i32
    %c0_i32_0 = arith.constant 0 : i32
    %2 = arith.cmpi ne, %1, %c0_i32_0 : i32
    scf.if %2 {
      %cst_10 = arith.constant 0.000000e+00 : f32
      %12 = vector.broadcast %cst_10 : f32 to vector<256x128xf32>
      %c0_11 = arith.constant 0 : index
      %c0_12 = arith.constant 0 : index
      %13 = vector.load %arg7[%c0_11, %c0_12] : memref<256x128xf32, #tpu.memory_space<vmem>>, vector<256x128xf32>
      tpu.vector_store %arg7[%c0_11, %c0_12], %12 {strides = array<i32>} : memref<256x128xf32, #tpu.memory_space<vmem>>, vector<256x128xf32>,
    } else {
    }
    %c0 = arith.constant 0 : index
    %c0_1 = arith.constant 0 : index
    %3 = vector.load %arg7[%c0, %c0_1] : memref<256x128xf32, #tpu.memory_space<vmem>>, vector<256x128xf32>
    %c0_2 = arith.constant 0 : index
    %c0_3 = arith.constant 0 : index
    %4 = vector.load %arg3[%c0_2, %c0_3] : memref<256x36xf32, #tpu.memory_space<vmem>>, vector<256x36xf32>
    %c0_4 = arith.constant 0 : index
    %c0_5 = arith.constant 0 : index
    %5 = vector.load %arg4[%c0_4, %c0_5] : memref<36x128xf32, #tpu.memory_space<vmem>>, vector<36x128xf32>
    %cst = arith.constant dense<0.000000e+00> : vector<256x128xf32>
    %6 = tpu.matmul %4, %5, %cst {dimension_numbers = #tpu.dot_dimension_numbers<[1], [0], [0], [1], [0, 0, 1, 1], [], []>} : vector<256x36xf32>, vector<36x128xf32>, vector<256x128xf32> -> vector<256x128xf32>
    %7 = arith.addf %3, %6 : vector<256x128xf32>
    %c0_6 = arith.constant 0 : index
    %c0_7 = arith.constant 0 : index
    %8 = vector.load %arg7[%c0_6, %c0_7] : memref<256x128xf32, #tpu.memory_space<vmem>>, vector<256x128xf32>
    tpu.vector_store %arg7[%c0_6, %c0_7], %7 {strides = array<i32>} : memref<256x128xf32, #tpu.memory_space<vmem>>, vector<256x128xf32>,
    %c0_i32_8 = arith.constant 0 : i32
    %9 = arith.cmpi eq, %arg2, %c0_i32_8 : i32
    %10 = arith.extui %9 : i1 to i32
    %c0_i32_9 = arith.constant 0 : i32
    %11 = arith.cmpi ne, %10, %c0_i32_9 : i32
    scf.if %11 {
      %c0_10 = arith.constant 0 : index
      %c0_11 = arith.constant 0 : index
      %12 = vector.load %arg7[%c0_10, %c0_11] : memref<256x128xf32, #tpu.memory_space<vmem>>, vector<256x128xf32>
      %c0_12 = arith.constant 0 : index
      %c0_13 = arith.constant 0 : index
      %13 = vector.load %arg5[%c0_12, %c0_13] : memref<1x128xf32, #tpu.memory_space<vmem>>, vector<1x128xf32>
      %14 = vector.broadcast %13 : vector<1x128xf32> to vector<256x128xf32>
      %15 = arith.addf %12, %14 : vector<256x128xf32>
      %c0_14 = arith.constant 0 : index
      %c0_15 = arith.constant 0 : index
      %16 = vector.load %arg6[%c0_14, %c0_15] : memref<256x128xf32, #tpu.memory_space<vmem>>, vector<256x128xf32>
      tpu.vector_store %arg6[%c0_14, %c0_15], %15 {strides = array<i32>} : memref<256x128xf32, #tpu.memory_space<vmem>>, vector<256x128xf32>,
    } else {
    }
    return
  }
  func.func @transform_0(%arg0: i32, %arg1: i32, %arg2: i32) -> (i32, i32) {
    %c0_i32 = arith.constant 0 : i32
    return %arg0, %arg2 : i32, i32
  }
  func.func @transform_1(%arg0: i32, %arg1: i32, %arg2: i32) -> (i32, i32) {
    %c0_i32 = arith.constant 0 : i32
    return %arg2, %arg1 : i32, i32
  }
  func.func @transform_2(%arg0: i32, %arg1: i32, %arg2: i32) -> (i32, i32) {
    %c0_i32 = arith.constant 0 : i32
    %c0_i32_0 = arith.constant 0 : i32
    return %c0_i32, %arg1 : i32, i32
  }
  func.func @transform_3(%arg0: i32, %arg1: i32, %arg2: i32) -> (i32, i32) {
    %c0_i32 = arith.constant 0 : i32
    return %arg0, %arg1 : i32, i32
  }
}

</mosaic_0001>

<bundles_post_ra>
// kernel: tpu_custom_call.1
= control target key start
LH: loop header
LB: loop body
LE: loop exit
PB: predicated region body
PF: predicated region fallthrough
CT: control target
= control target key end

     0   :  { %8 = vsyncpa [#allocation4], 0  ;;  %s1569_s0 = inlined_call_operand.vmem [shape: f32[512,36], index: 0, kind: input, shape index: {}]   ;;  %s1570_s1 = inlined_call_operand.vmem [shape: f32[36,128], index: 1, kind: input, shape index: {}]   ;;  %s1571_s2 = inlined_call_operand.vmem [shape: f32[1,128], index: 2, kind: input, shape index: {}]   ;;  %s1572_s3 = inlined_call_operand.hbm [shape: f32[512,128], index: 3, kind: output, shape index: {}]  }
   0x1   :  { %10 = vsyncpa [#allocation4 + $0x1], 0  ;;  %s1294_s12 = smov 0   ;;  %s1296_s13 = smov 0  }
   0x2   :  { %s1298_s14 = smov 0   ;;  %s1300_s15 = smov 0  }
   0x3   :  { %s1302_s16 = smov 0   ;;  %s1304_s17 = smov 0  }
   0x4 LB: > { %s975_s18 = sadd.s32 4294967295, %s1269_s17   ;;  %s976_s19 = sadd.s32 4294967294, %s1269_s17   ;;  %s1269_s17 = sphi %s1304_s17, %s16_s17   ;;  %s1265_s16 = sphi %s1302_s16, %s1579_s16   ;;  %s1261_s15 = sphi %s1300_s15, %s1578_s15   ;;  %s1257_s14 = sphi %s1298_s14, %s1577_s14   ;;  %s1253_s13 = sphi %s1296_s13, %s1576_s13   ;;  %s1249_s12 = sphi %s1294_s12, %s1575_s12  }
   0x5   : > { %s35_s20 = sadd.s32 1, %s1265_s16  ;;  %s126_s21 = sadd.s32 1, %s1257_s14 }
   0x6   : > { %p37_p0 = scmp.ge.s32.totalorder %s35_s20, 2  ;;  %p136_p1 = scmp.ne.s32.totalorder %s1257_s14, %s1253_s13 }
   0x7   : > { %p137_p2 = scmp.eq.s32.totalorder %s975_s18, 1  ;;  %p142_p3 = scmp.ne.s32.totalorder %s1253_s13, %s1249_s12 }
   0x8   : > { %s1581_s20 = smov (%p37_p0, %s35_s20), 0  ;;  %p143_p5 = scmp.eq.s32.totalorder %s976_s19, 1 }
   0x9   : > { %p1334_p4 = por %p137_p2, %p136_p1  ;;  %s121_s23 = ssub.s32 %s1265_s16, %s1581_s20 }
   0xa   : > { %p981_p6 = scmp.ge.s32.totalorder %s1269_s17, 1  ;;  %p124_p7 = scmp.eq.s32.totalorder %s121_s23, 0 }
   0xb   : > { %p1341_p8 = por %p143_p5, %p142_p3  ;;  %p191_p9 = scmp.lt.s32.totalorder %s1269_s17, 3 }
   0xc   : > { %s1347_s25 = scalar_select %p124_p7, %s1257_s14, %s126_s21  }
   0xd   : > { %p192_p10 = pnand %p981_p6, %p191_p9 }
   0xe   : > { %v351_v0 = vld [vmem:[%s1570_s1] sm:$0xff] (!%p192_p10)  ;;  %v352_v1 = vld [vmem:[%s1570_s1 + $0x8] sm:$0xff] (!%p192_p10)  ;;  %v353_v2 = vld [vmem:[%s1570_s1 + $0x10] sm:$0xff] (!%p192_p10)  ;;  %s983_s5 = sshll.u32 (!%p192_p10), %s1261_s15, 5  ;;  %vm453_vm0 = vcmask (!%p192_p10), 1043456   ;;  %vm356_vm1 = vcmask (!%p192_p10), 293888  }
   0xf   : > { %195 = sbr.rel (%p192_p10) target bundleno = 286 (0x11e), region = 32  ;;  %v1120_v3 = vpack.c.bf16 (!%p192_p10), %v352_v1, %v351_v0  ;;  %v354_v4 = vld [vmem:[%s1570_s1 + $0x18] sm:$0xff] (!%p192_p10)  ;;  %p230_p11 = scmp.lt.s32.totalorder (!%p192_p10), %s983_s5, 63  ;;  %v355_v6 = vld [vmem:[%s1570_s1 + $0x20] sm:$0xf] (!%p192_p10) }
  0x10   : > { %v1124_v5 = vpack.c.bf16 (!%p192_p10), %v354_v4, %v353_v2  ;;  %s226_s21 = sand.u32 (!%p192_p10), 1, %s1253_s13   ;;  %v1444_v39 = vld [vmem:[%s1571_s2] ss:$0 sm:$0xff] (!%p192_p10)  ;;  %s1024_s29 = sshll.u32 (!%p192_p10), %s1261_s15, 12 }
  0x11   : > { %1121 = vmatprep.subr.bf16.mxu0 (!%p192_p10), %v1120_v3  ;;  %1128 = vmatprep.subr.bf16.mxu1 (!%p192_p10), %v1120_v3  ;;  %s982_s23 = sshll.u32 (!%p192_p10), %s226_s21, 8  ;;  %s1523_s6 = scalar_lea.sflag (!%p192_p10), [#allocation4], %s226_s21 }
  0x12   : > { %1123 = vmatpush3.bf16.msra.mxu0 (!%p192_p10), %v1120_v3  ;;  %1131 = vmatpush3.bf16.msra.mxu1 (!%p192_p10), %v1120_v3  ;;  %s1450_s28 = scalar_lea.vmem (!%p192_p10), [#allocation3], %s982_s23 }
  0x13   : > { %1125 = vmatprep.subr.bf16.mxu0 (!%p192_p10), %v1124_v5  ;;  %1129 = vmatprep.subr.bf16.mxu1 (!%p192_p10), %v1124_v5  ;;  %s867_s30 = sshll.u32 (!%p192_p10), %s1450_s28, 4  ;;  %s1513_s30 = int_to_ptr.vmem [resolvable:$true] %s867_s30 }
  0x14   : > { %s1191_s7 = scalar_lea.vmem (!%p192_p10), %s1513_s30, 4096 }
  0x15   : > { %p1192_p12 = scmp.ne.s32.totalorder (!%p192_p10), %s1513_s30, %s1191_s7 }
  0x16   : > { %s1583_s5 = smov (!%p230_p11, %s983_s5), 63  ;;  %1127 = vmatpush3.bf16.msra.mxu0 %v1124_v5  ;;  %1132 = vmatpush3.bf16.msra.mxu1 %v1124_v5 }
  0x17   : > { %s984_s8 = sshll.u32 %s1583_s5, 3  ;;  %1070 = vmatprep.subr.msk.mxu0 %vm453_vm0, %v355_v6  ;;  %1130 = vmatprep.subr.msk.mxu1 %vm453_vm0, %v355_v6  ;;  %s1511_s5 = scalar_lea.hbm %s1572_s3, %s1024_s29 }
  0x18   : > { %s1368_s19 = scalar_lea.vmem %s1569_s0, %s984_s8  ;;  %p1193_p13 = pnand %p1192_p12, %p1334_p4 }
  0x19   : > { %v319_v7 = vld [vmem:[%s1368_s19] sm:$0xff]  ;;  %v320_v9 = vld [vmem:[%s1368_s19 + $0x8] sm:$0xff]  ;;  %v321_v11 = vld [vmem:[%s1368_s19 + $0x10] sm:$0xff]  ;;  %s1271_s8 = smov [#allocation3]  }
  0x1a   : > { %v335_v8 = vld [vmem:[%s1368_s19 + $0x80] sm:$0xff]  ;;  %1072 = vmatprep.mubr.msk.f32.mxu0 %vm356_vm1, %v319_v7  ;;  %v336_v10 = vld [vmem:[%s1368_s19 + $0x88] sm:$0xff]  ;;  %v337_v12 = vld [vmem:[%s1368_s19 + $0x90] sm:$0xff]  ;;  %1071 = vmatpush3.msk.msra.mxu0 %vm453_vm0, %v355_v6  ;;  %p1194_p0 = pneg %p1193_p13  ;;  %s1195_s9 = sshll.u32 %s1271_s8, 4  ;;  %s1196_s9 = int_to_ptr.vmem [resolvable:$false] %s1195_s9 }
  0x1b   : > { %1096 = vmatprep.mubr.msk.f32.mxu1 %vm356_vm1, %v335_v8  ;;  %1133 = vmatpush3.msk.msra.mxu1 %vm453_vm0, %v355_v6  ;;  %v322_v13 = vld [vmem:[%s1368_s19 + $0x18] sm:$0xff]  ;;  %v323_v15 = vld [vmem:[%s1368_s19 + $0x20] sm:$0xff]  ;;  %v324_v17 = vld [vmem:[%s1368_s19 + $0x28] sm:$0xff]  ;;  %s1197_s10 = scalar_lea.vmem %s1196_s9, 8192  ;;  %p1198_p1 = scmp.lt.s32.totalorder %s1513_s30, %s1196_s9 }
  0x1c   : > { %1073 = vmatmul.mubr.msk.f32.vlgmr.msra.gmra.mrb[0].mxu0 %vm356_vm1, %v320_v9  ;;  %1097 = vmatmul.mubr.msk.f32.vlgmr.msra.gmra.mrb[0].mxu1 %vm356_vm1, %v336_v10  ;;  %v338_v14 = vld [vmem:[%s1368_s19 + $0x98] sm:$0xff]  ;;  %v339_v16 = vld [vmem:[%s1368_s19 + $0xa0] sm:$0xff]  ;;  %v340_v18 = vld [vmem:[%s1368_s19 + $0xa8] sm:$0xff]  ;;  %p1199_p2 = scmp.lt.s32.totalorder %s1197_s10, %s1191_s7 }
  0x1d   : > { %1075 = vmatprep.mubr.msk.f32.mxu0 %vm356_vm1, %v321_v11  ;;  %1099 = vmatprep.mubr.msk.f32.mxu1 %vm356_vm1, %v337_v12  ;;  %v325_v19 = vld [vmem:[%s1368_s19 + $0x30] sm:$0xff]  ;;  %v326_v21 = vld [vmem:[%s1368_s19 + $0x38] sm:$0xff]  ;;  %v327_v23 = vld [vmem:[%s1368_s19 + $0x40] sm:$0xff] }
  0x1e   : > { %v341_v20 = vld [vmem:[%s1368_s19 + $0xb0] sm:$0xff]  ;;  %v342_v22 = vld [vmem:[%s1368_s19 + $0xb8] sm:$0xff]  ;;  %v343_v24 = vld [vmem:[%s1368_s19 + $0xc0] sm:$0xff]  ;;  %p1200_p3 = por %p1199_p2, %p1198_p1 }
  0x1f   : > { %v328_v25 = vld [vmem:[%s1368_s19 + $0x48] sm:$0xff]  ;;  %v329_v27 = vld [vmem:[%s1368_s19 + $0x50] sm:$0xff]  ;;  %v330_v29 = vld [vmem:[%s1368_s19 + $0x58] sm:$0xff] }
  0x20   : > { %1076 = vmatmul.mubr.msk.f32.gmra.mrb[2].mxu0 %vm356_vm1, %v322_v13  ;;  %1100 = vmatmul.mubr.msk.f32.gmra.mrb[2].mxu1 %vm356_vm1, %v338_v14  ;;  %v344_v26 = vld [vmem:[%s1368_s19 + $0xc8] sm:$0xff]  ;;  %v345_v28 = vld [vmem:[%s1368_s19 + $0xd0] sm:$0xff]  ;;  %v346_v30 = vld [vmem:[%s1368_s19 + $0xd8] sm:$0xff]  ;;  %p1201_p5 = pnand %p1200_p3, %p1194_p0 }
  0x21   : > { %1078 = vmatprep.mubr.msk.f32.mxu0 %vm356_vm1, %v323_v15  ;;  %1102 = vmatprep.mubr.msk.f32.mxu1 %vm356_vm1, %v339_v16  ;;  %v331_v31 = vld [vmem:[%s1368_s19 + $0x60] sm:$0xff]  ;;  %v332_v33 = vld [vmem:[%s1368_s19 + $0x68] sm:$0xff]  ;;  %v333_v35 = vld [vmem:[%s1368_s19 + $0x70] sm:$0xff] }
  0x22   : > { %v347_v32 = vld [vmem:[%s1368_s19 + $0xe0] sm:$0xff]  ;;  %v348_v34 = vld [vmem:[%s1368_s19 + $0xe8] sm:$0xff]  ;;  %v349_v36 = vld [vmem:[%s1368_s19 + $0xf0] sm:$0xff] }
  0x23   : > { %v334_v37 = vld [vmem:[%s1368_s19 + $0x78] sm:$0xff] }
  0x24   : > { %1079 = vmatmul.mubr.msk.f32.gmra.mrb[4].mxu0 %vm356_vm1, %v324_v17  ;;  %1103 = vmatmul.mubr.msk.f32.gmra.mrb[4].mxu1 %vm356_vm1, %v340_v18  ;;  %v350_v38 = vld [vmem:[%s1368_s19 + $0xf8] sm:$0xff] }
  0x25   : > { %1081 = vmatprep.mubr.msk.f32.mxu0 %vm356_vm1, %v325_v19  ;;  %1105 = vmatprep.mubr.msk.f32.mxu1 %vm356_vm1, %v341_v20 }
  0x28   : > { %1082 = vmatmul.mubr.msk.f32.gmra.mrb[6].mxu0 %vm356_vm1, %v326_v21  ;;  %1106 = vmatmul.mubr.msk.f32.gmra.mrb[6].mxu1 %vm356_vm1, %v342_v22 }
  0x29   : > { %1084 = vmatprep.mubr.msk.f32.mxu0 %vm356_vm1, %v327_v23  ;;  %1108 = vmatprep.mubr.msk.f32.mxu1 %vm356_vm1, %v343_v24 }
  0x2c   : > { %1085 = vmatmul.mubr.msk.f32.gmra.mrb[8].mxu0 %vm356_vm1, %v328_v25  ;;  %1109 = vmatmul.mubr.msk.f32.gmra.mrb[8].mxu1 %vm356_vm1, %v344_v26 }
  0x2d   : > { %1087 = vmatprep.mubr.msk.f32.mxu0 %vm356_vm1, %v329_v27  ;;  %1111 = vmatprep.mubr.msk.f32.mxu1 %vm356_vm1, %v345_v28 }
  0x30   : > { %1088 = vmatmul.mubr.msk.f32.gmra.mrb[10].mxu0 %vm356_vm1, %v330_v29  ;;  %1112 = vmatmul.mubr.msk.f32.gmra.mrb[10].mxu1 %vm356_vm1, %v346_v30 }
  0x31   : > { %1090 = vmatprep.mubr.msk.f32.mxu0 %vm356_vm1, %v331_v31  ;;  %1114 = vmatprep.mubr.msk.f32.mxu1 %vm356_vm1, %v347_v32 }
  0x34   : > { %1091 = vmatmul.mubr.msk.f32.gmra.mrb[12].mxu0 %vm356_vm1, %v332_v33  ;;  %1115 = vmatmul.mubr.msk.f32.gmra.mrb[12].mxu1 %vm356_vm1, %v348_v34 }
  0x35   : > { %1093 = vmatprep.mubr.msk.f32.mxu0 %vm356_vm1, %v333_v35  ;;  %1117 = vmatprep.mubr.msk.f32.mxu1 %vm356_vm1, %v349_v36 }
  0x38   : > { %1094 = vmatmul.mubr.msk.f32.gmra.mrb[14].mxu0 %vm356_vm1, %v334_v37  ;;  %1118 = vmatmul.mubr.msk.f32.gmra.mrb[14].mxu1 %vm356_vm1, %v350_v38 }
  0xef   : > { %v1074_v40 = vpop.f32.mrb[0].mxu0  ;;  %v1098_v41 = vpop.f32.mrb[0].mxu1 }
  0xf0   : > { %v789_v42 = vadd.f32 %v1074_v40, %v1444_v39  ;;  %v805_v43 = vadd.f32 %v1098_v41, %v1444_v39  ;;  %v523_v44 = vpop.f32.mrb[1].mxu0  ;;  %v603_v45 = vpop.f32.mrb[1].mxu1 }
  0xf1   : > { %v788_v46 = vadd.f32 %v1444_v39, %v523_v44  ;;  %v804_v47 = vadd.f32 %v1444_v39, %v603_v45 }
  0xf2   : > { %821 = vst [vmem:[%s1450_s28 + $0x8] sm:$0xff] %v789_v42  ;;  %837 = vst [vmem:[%s1450_s28 + $0x88] sm:$0xff] %v805_v43 }
  0xf3   : > { %820 = vst [vmem:[%s1450_s28] sm:$0xff] %v788_v46  ;;  %836 = vst [vmem:[%s1450_s28 + $0x80] sm:$0xff] %v804_v47  ;;  %v1077_v48 = vpop.f32.mrb[2].mxu0  ;;  %v1101_v49 = vpop.f32.mrb[2].mxu1 }
  0xf4   : > { %v791_v50 = vadd.f32 %v1077_v48, %v1444_v39  ;;  %v807_v51 = vadd.f32 %v1101_v49, %v1444_v39  ;;  %v533_v52 = vpop.f32.mrb[3].mxu0  ;;  %v613_v53 = vpop.f32.mrb[3].mxu1 }
  0xf5   : > { %v790_v54 = vadd.f32 %v1444_v39, %v533_v52  ;;  %v806_v55 = vadd.f32 %v1444_v39, %v613_v53 }
  0xf6   : > { %823 = vst [vmem:[%s1450_s28 + $0x18] sm:$0xff] %v791_v50  ;;  %839 = vst [vmem:[%s1450_s28 + $0x98] sm:$0xff] %v807_v51 }
  0xf7   : > { %822 = vst [vmem:[%s1450_s28 + $0x10] sm:$0xff] %v790_v54  ;;  %838 = vst [vmem:[%s1450_s28 + $0x90] sm:$0xff] %v806_v55  ;;  %v1080_v56 = vpop.f32.mrb[4].mxu0  ;;  %v1104_v57 = vpop.f32.mrb[4].mxu1 }
  0xf8   : > { %v793_v58 = vadd.f32 %v1080_v56, %v1444_v39  ;;  %v809_v59 = vadd.f32 %v1104_v57, %v1444_v39  ;;  %v543_v60 = vpop.f32.mrb[5].mxu0  ;;  %v623_v61 = vpop.f32.mrb[5].mxu1 }
  0xf9   : > { %v792_v62 = vadd.f32 %v1444_v39, %v543_v60  ;;  %v808_v63 = vadd.f32 %v1444_v39, %v623_v61 }
  0xfa   : > { %825 = vst [vmem:[%s1450_s28 + $0x28] sm:$0xff] %v793_v58  ;;  %841 = vst [vmem:[%s1450_s28 + $0xa8] sm:$0xff] %v809_v59 }
  0xfb   : > { %824 = vst [vmem:[%s1450_s28 + $0x20] sm:$0xff] %v792_v62  ;;  %840 = vst [vmem:[%s1450_s28 + $0xa0] sm:$0xff] %v808_v63  ;;  %v1083_v0 = vpop.f32.mrb[6].mxu0  ;;  %v1107_v1 = vpop.f32.mrb[6].mxu1 }
  0xfc   : > { %v795_v2 = vadd.f32 %v1083_v0, %v1444_v39  ;;  %v811_v3 = vadd.f32 %v1107_v1, %v1444_v39  ;;  %v553_v4 = vpop.f32.mrb[7].mxu0  ;;  %v633_v5 = vpop.f32.mrb[7].mxu1 }
  0xfd   : > { %v794_v6 = vadd.f32 %v1444_v39, %v553_v4  ;;  %v810_v7 = vadd.f32 %v1444_v39, %v633_v5 }
  0xfe   : > { %827 = vst [vmem:[%s1450_s28 + $0x38] sm:$0xff] %v795_v2  ;;  %843 = vst [vmem:[%s1450_s28 + $0xb8] sm:$0xff] %v811_v3 }
  0xff   : > { %826 = vst [vmem:[%s1450_s28 + $0x30] sm:$0xff] %v794_v6  ;;  %842 = vst [vmem:[%s1450_s28 + $0xb0] sm:$0xff] %v810_v7  ;;  %v1086_v8 = vpop.f32.mrb[8].mxu0  ;;  %v1110_v9 = vpop.f32.mrb[8].mxu1 }
 0x100   : > { %v797_v10 = vadd.f32 %v1086_v8, %v1444_v39  ;;  %v813_v11 = vadd.f32 %v1110_v9, %v1444_v39  ;;  %v563_v12 = vpop.f32.mrb[9].mxu0  ;;  %v643_v13 = vpop.f32.mrb[9].mxu1 }
 0x101   : > { %v796_v14 = vadd.f32 %v1444_v39, %v563_v12  ;;  %v812_v15 = vadd.f32 %v1444_v39, %v643_v13 }
 0x102   : > { %829 = vst [vmem:[%s1450_s28 + $0x48] sm:$0xff] %v797_v10  ;;  %845 = vst [vmem:[%s1450_s28 + $0xc8] sm:$0xff] %v813_v11 }
 0x103   : > { %828 = vst [vmem:[%s1450_s28 + $0x40] sm:$0xff] %v796_v14  ;;  %844 = vst [vmem:[%s1450_s28 + $0xc0] sm:$0xff] %v812_v15  ;;  %v1089_v16 = vpop.f32.mrb[10].mxu0  ;;  %v1113_v17 = vpop.f32.mrb[10].mxu1 }
 0x104   : > { %v799_v18 = vadd.f32 %v1089_v16, %v1444_v39  ;;  %v815_v19 = vadd.f32 %v1113_v17, %v1444_v39  ;;  %v573_v20 = vpop.f32.mrb[11].mxu0  ;;  %v653_v21 = vpop.f32.mrb[11].mxu1 }
 0x105   : > { %v798_v22 = vadd.f32 %v1444_v39, %v573_v20  ;;  %v814_v23 = vadd.f32 %v1444_v39, %v653_v21 }
 0x106   : > { %831 = vst [vmem:[%s1450_s28 + $0x58] sm:$0xff] %v799_v18  ;;  %847 = vst [vmem:[%s1450_s28 + $0xd8] sm:$0xff] %v815_v19 }
 0x107   : > { %830 = vst [vmem:[%s1450_s28 + $0x50] sm:$0xff] %v798_v22  ;;  %846 = vst [vmem:[%s1450_s28 + $0xd0] sm:$0xff] %v814_v23  ;;  %v1092_v24 = vpop.f32.mrb[12].mxu0  ;;  %v1116_v25 = vpop.f32.mrb[12].mxu1 }
 0x108   : > { %v801_v26 = vadd.f32 %v1092_v24, %v1444_v39  ;;  %v817_v27 = vadd.f32 %v1116_v25, %v1444_v39  ;;  %v583_v28 = vpop.f32.mrb[13].mxu0  ;;  %v663_v29 = vpop.f32.mrb[13].mxu1 }
 0x109   : > { %v800_v30 = vadd.f32 %v1444_v39, %v583_v28  ;;  %v816_v31 = vadd.f32 %v1444_v39, %v663_v29 }
 0x10a   : > { %833 = vst [vmem:[%s1450_s28 + $0x68] sm:$0xff] %v801_v26  ;;  %849 = vst [vmem:[%s1450_s28 + $0xe8] sm:$0xff] %v817_v27 }
 0x10b   : > { %832 = vst [vmem:[%s1450_s28 + $0x60] sm:$0xff] %v800_v30  ;;  %848 = vst [vmem:[%s1450_s28 + $0xe0] sm:$0xff] %v816_v31  ;;  %v1095_v32 = vpop.f32.mrb[14].mxu0  ;;  %v1119_v33 = vpop.f32.mrb[14].mxu1 }
 0x10c   : > { %v803_v34 = vadd.f32 %v1095_v32, %v1444_v39  ;;  %v819_v35 = vadd.f32 %v1119_v33, %v1444_v39  ;;  %v593_v36 = vpop.f32.mrb[15].mxu0  ;;  %v673_v37 = vpop.f32.mrb[15].mxu1 }
 0x10d   : > { %v802_v38 = vadd.f32 %v1444_v39, %v593_v36  ;;  %v818_v40 = vadd.f32 %v1444_v39, %v673_v37 }
 0x10e   : > { %835 = vst [vmem:[%s1450_s28 + $0x78] sm:$0xff] %v803_v34  ;;  %851 = vst [vmem:[%s1450_s28 + $0xf8] sm:$0xff] %v819_v35 }
 0x10f   : > { %834 = vst [vmem:[%s1450_s28 + $0x70] sm:$0xff] %v802_v38  ;;  %850 = vst [vmem:[%s1450_s28 + $0xf0] sm:$0xff] %v818_v40 }
 0x110   : > { %1204 = shalt.err (!%p1201_p5)
}
 0x111   : > { %s1205_s11 = scalar_lea.hbm %s1511_s5, 4096  ;;  %s1209_s21 = scalar_lea.hbm %s1572_s3, 8192 }
 0x112   : > { %p1206_p6 = scmp.ne.s32.totalorder %s1511_s5, %s1205_s11  ;;  %p1210_p10 = scmp.lt.u32.totalorder %s1511_s5, %s1572_s3 }
 0x113   : > { %p1211_p11 = scmp.lt.u32.totalorder %s1209_s21, %s1205_s11  ;;  %p1213_p13 = scmp.lt.u32.totalorder %s1205_s11, %s1511_s5 }
 0x114   : > { %p1207_p7 = pnand %p1206_p6, %p1334_p4 }
 0x115   : > { %p1212_p12 = por %p1211_p11, %p1210_p10 }
 0x116   : > { %p1208_p9 = pneg %p1207_p7 }
 0x117   : > { %p1214_p0 = por %p1213_p13, %p1212_p12 }
 0x119   : > { %p1215_p1 = pnand %p1214_p0, %p1208_p9 }
 0x11b   : > { %1218 = shalt.err (!%p1215_p1)
}
 0x11c   : > { %s1272_s27 = smov 128   ;;  %s1273_s28 = smov 8  }
 0x11d   : > { %1134 = dma.vmem_to_hbm [thread:$0]  (%p1334_p4), %s1513_s30, 4096, %s1511_s5, %s1523_s6, %s1272_s27, %s1272_s27, %s1273_s28  }
 0x11e PF: > { %p1140_p2 = scmp.ge.s32.totalorder %s1269_s17, 2  ;;  %s882_s29 = sand.u32 1, %s1249_s12  }
 0x11f   : > { %s883_s15 = scalar_lea.sflag [#allocation4], %s882_s29 }
 0x120   : > { %p1137_p3 = pnand %p1140_p2, %p1341_p8 }
 0x122   : > { %1244 = dma.done.wait (!%p1137_p3), %s883_s15, 4096  }
 0x123   : > { %1246 = vsyncadd (!%p1137_p3), %s883_s15, 4294963200  ;;  %s16_s17 = sadd.s32 1, %s1269_s17   ;;  %s1575_s12 = smov %s1253_s13 }
 0x124   : > { %p13_p5 = scmp.ge.s32.totalorder %s16_s17, 4   ;;  %s1576_s13 = smov %s1257_s14 }
 0x125   : > { %s1577_s14 = smov %s1347_s25  ;;  %s1578_s15 = smov %s1265_s16 }
 0x126   : > { %s1579_s16 = smov %s1581_s20  ;;  %15 = sbr.rel (!%p13_p5) target bundleno = 4 (0x4), region = 81 }
 0x12d   :  { %888 = vsyncpa [#allocation4], 1 }
 0x12e   :  { %890 = vsyncpa [#allocation4 + $0x1], 1 }

</bundles_post_ra>
